<compile_context>
chip_gen: v6e
topology: v6e:2x2x1
jax: 0.10.0
libtpu: 0.0.40
codegen_flags: <defaults>
</compile_context>

<pallas_src>
import jax
import jax.numpy as jnp
from jax.experimental import pallas as pl
from jax.experimental.pallas import tpu as pltpu


def _round_up(a, m):
    return ((a + m - 1) // m) * m


def _pointwise_conv_relu_kernel(x_ref, w_ref, b_ref, o_ref):
    # x_ref: (bb, C, TN) f32   w_ref: (F, C) f32   b_ref: (F, 1) f32
    # o_ref: (bb, F, TN) f32
    w = w_ref[...]
    bias = b_ref[...]
    for i in range(x_ref.shape[0]):  # static, small bb
        acc = jnp.dot(w, x_ref[i], preferred_element_type=jnp.float32)  # (F, TN)
        o_ref[i] = jnp.maximum(acc + bias, 0.0).astype(o_ref.dtype)


def pointwise_conv_relu_nchw(x, w, b, *, tn_target=1024):
    """1x1 conv + ReLU in native NCHW (f32).

    x: (B, C, H, W) f32, w: (F, C) f32 (PyTorch Conv2d-style (out, in)),
    b: (F,) f32  ->  (B, F, H, W) f32.
    """
    B, C, H, W = x.shape
    F = w.shape[0]
    N = H * W

    # Lane-dense pixel tile (multiple of 128).  No wrapper-side padding: the
    # ragged last tile (if any) is masked by Pallas on the output store; the
    # corresponding out-of-bounds input lanes are never used for reductions.
    n128 = _round_up(N, 128)
    tn = min(tn_target, n128)
    n_tiles = pl.cdiv(N, tn)

    # Batch blocking: keep ~tn_target lanes of work per grid step even when
    # the image is small, so per-step overhead stays amortized.
    bb = max(1, min(B, tn_target // tn))
    nb = pl.cdiv(B, bb)

    # v7x has 2 TensorCores per chip: keep >= 2 parallel grid steps if we can.
    if nb * n_tiles < 2:
        if bb > 1:
            bb = max(1, bb // 2)
            nb = pl.cdiv(B, bb)
        elif tn > 128 and N > 128:
            tn = _round_up(tn // 2, 128)
            n_tiles = pl.cdiv(N, tn)

    x3 = x.reshape(B, C, N)          # free reshape (contiguous), no transpose
    b2 = b.reshape(F, 1)

    grid = (nb, n_tiles)

    # Explicit VMEM budget: double-buffered input/output blocks + resident
    # weight/bias, with 4x headroom; floor 16 MiB (v5e default scoped limit),
    # cap 48 MiB (under v7x's 64 MiB physical VMEM).
    blk_bytes = 4 * (2 * bb * C * tn + 2 * bb * F * tn + F * C + F)
    vmem_limit = int(min(48 << 20, max(16 << 20, 4 * blk_bytes)))

    y3 = pl.pallas_call(
        _pointwise_conv_relu_kernel,
        out_shape=jax.ShapeDtypeStruct((B, F, N), jnp.float32),
        grid=grid,
        in_specs=[
            # activations: (bb, C, tn) slab, pixels on lanes
            pl.BlockSpec((bb, C, tn), lambda ib, j: (ib, 0, j)),
            # weight + bias: tiny, resident across the whole grid
            pl.BlockSpec((F, C), lambda ib, j: (0, 0)),
            pl.BlockSpec((F, 1), lambda ib, j: (0, 0)),
        ],
        out_specs=pl.BlockSpec((bb, F, tn), lambda ib, j: (ib, 0, j)),
        compiler_params=pltpu.CompilerParams(
            # NOTE: if C/F ever reach MXU scale (hundreds+), add an F-axis grid
            # dim and a trailing "arbitrary" C-reduction axis with an f32 VMEM
            # accumulator; tile F/C to 256 on v6e/v7x, 128 on v5e.
            dimension_semantics=("parallel", "parallel"),
            vmem_limit_bytes=vmem_limit,
        ),
        cost_estimate=pl.CostEstimate(
            flops=2 * B * F * C * N,
            transcendentals=0,
            bytes_accessed=(B * C * N + F * C + F + B * F * N) * 4,
        ),
    )(x3, w, b2)

    return y3.reshape(B, F, H, W)


# Jitted so the (cheap) reshapes fuse around the pallas_call.
_pointwise_conv_relu_jit = jax.jit(
    pointwise_conv_relu_nchw, static_argnames=("tn_target",)
)


class PallasBaseModel:
    """Minimal concrete BaseModel: 1x1 conv + ReLU feature extractor."""

    def __init__(self, config):
        self.config = config
        in_ch = config["in_channels"]
        out_ch = config["out_channels"]
        key = jax.random.PRNGKey(config.get("seed", 0))
        kw, kb = jax.random.split(key)
        # Deterministic synthetic parameters (stand-in for a checkpoint),
        # PyTorch Conv2d-style (out_channels, in_channels) 1x1 weight.
        self.weight = jax.random.normal(kw, (out_ch, in_ch), jnp.float32) * 0.1
        self.bias = jax.random.normal(kb, (out_ch,), jnp.float32) * 0.1

    @classmethod
    def from_config(cls, config):
        return cls(config)

    # TODO(synk): load_pretrained_weights / freeze_layers / unfreeze_layers /
    # get_module are framework plumbing (file I/O, nn.Module registry, logger)
    # with no Pallas analog.

    def forward(self, batch):
        x = batch["x"]                            # (B, C, H, W) NCHW, like PyTorch
        y = _pointwise_conv_relu_jit(x, self.weight, self.bias)
        return {"features": y}

    __call__ = forward


if __name__ == "__main__":
    config = {"in_channels": 4, "out_channels": 8, "seed": 0}
    model = PallasBaseModel.from_config(config)

    key = jax.random.PRNGKey(0)
    x = jax.random.normal(key, (2, 4, 16, 16), jnp.float32)  # B=2, C=4, 16x16

    out = model({"x": x})
    feats = jax.block_until_ready(out["features"])

    # Pure f32 reference (matches the f32 kernel semantics).
    B, C, H, W = x.shape
    F = model.weight.shape[0]
    ref = jnp.einsum(
        "fc,bcn->bfn", model.weight, x.reshape(B, C, H * W),
        preferred_element_type=jnp.float32,
    ) + model.bias.reshape(1, F, 1)
    ref = jnp.maximum(ref, 0.0).reshape(B, F, H, W)

    assert feats.shape == (B, F, H, W)
    assert jnp.allclose(feats, ref, atol=1e-3, rtol=1e-3), float(
        jnp.max(jnp.abs(feats - ref))
    )

    print("KERNEL_OK")
</pallas_src>

<mosaic_0001>
module attributes {stable_mosaic.version = 11 : i64} {
  func.func @_pointwise_conv_relu_kernel(%arg0: i32, %arg1: i32, %arg2: memref<1x4x256xf32, #tpu.memory_space<vmem>>, %arg3: memref<8x4xf32, #tpu.memory_space<vmem>>, %arg4: memref<8x1xf32, #tpu.memory_space<vmem>>, %arg5: memref<1x8x256xf32, #tpu.memory_space<vmem>>) attributes {dimension_semantics = [#tpu.dimension_semantics<parallel>, #tpu.dimension_semantics<parallel>], iteration_bounds = array<i64: 2, 1>, scalar_prefetch = 0 : i64, scratch_operands = 0 : i64, tpu.core_type = #tpu.core_type<tc>, window_params = [{transform_indices = @transform_0, window_bounds = array<i64: 1, 4, 256>}, {pipeline_mode = #tpu.pipeline_mode<synchronous>, transform_indices = @transform_1, window_bounds = array<i64: 8, 4>}, {pipeline_mode = #tpu.pipeline_mode<synchronous>, transform_indices = @transform_2, window_bounds = array<i64: 8, 1>}, {transform_indices = @transform_3, window_bounds = array<i64: 1, 8, 256>}]} {
    %c0 = arith.constant 0 : index
    %c0_0 = arith.constant 0 : index
    %0 = vector.load %arg3[%c0, %c0_0] : memref<8x4xf32, #tpu.memory_space<vmem>>, vector<8x4xf32>
    %c0_1 = arith.constant 0 : index
    %c0_2 = arith.constant 0 : index
    %1 = vector.load %arg4[%c0_1, %c0_2] : memref<8x1xf32, #tpu.memory_space<vmem>>, vector<8x1xf32>
    %c0_3 = arith.constant 0 : index
    %c0_4 = arith.constant 0 : index
    %c0_5 = arith.constant 0 : index
    %2 = vector.load %arg2[%c0_3, %c0_4, %c0_5] : memref<1x4x256xf32, #tpu.memory_space<vmem>>, vector<1x4x256xf32>
    %3 = vector.shape_cast %2 : vector<1x4x256xf32> to vector<4x256xf32>
    %cst = arith.constant dense<0.000000e+00> : vector<8x256xf32>
    %4 = tpu.matmul %0, %3, %cst {dimension_numbers = #tpu.dot_dimension_numbers<[1], [0], [0], [1], [0, 0, 1, 1], [], []>} : vector<8x4xf32>, vector<4x256xf32>, vector<8x256xf32> -> vector<8x256xf32>
    %5 = vector.broadcast %1 : vector<8x1xf32> to vector<8x256xf32>
    %6 = arith.addf %4, %5 : vector<8x256xf32>
    %cst_6 = arith.constant 0.000000e+00 : f32
    %7 = vector.broadcast %cst_6 : f32 to vector<8x256xf32>
    %8 = arith.maximumf %6, %7 : vector<8x256xf32>
    %c0_7 = arith.constant 0 : index
    %c0_8 = arith.constant 0 : index
    %c0_9 = arith.constant 0 : index
    %9 = vector.load %arg5[%c0_7, %c0_8, %c0_9] : memref<1x8x256xf32, #tpu.memory_space<vmem>>, vector<1x8x256xf32>
    %10 = vector.shape_cast %9 : vector<1x8x256xf32> to vector<8x256xf32>
    %11 = vector.shape_cast %8 : vector<8x256xf32> to vector<1x8x256xf32>
    tpu.vector_store %arg5[%c0_7, %c0_8, %c0_9], %11 {strides = array<i32>} : memref<1x8x256xf32, #tpu.memory_space<vmem>>, vector<1x8x256xf32>,
    return
  }
  func.func @transform_0(%arg0: i32, %arg1: i32) -> (i32, i32, i32) {
    %c0_i32 = arith.constant 0 : i32
    %c0_i32_0 = arith.constant 0 : i32
    return %arg0, %c0_i32, %arg1 : i32, i32, i32
  }
  func.func @transform_1(%arg0: i32, %arg1: i32) -> (i32, i32) {
    %c0_i32 = arith.constant 0 : i32
    %c0_i32_0 = arith.constant 0 : i32
    %c0_i32_1 = arith.constant 0 : i32
    return %c0_i32, %c0_i32_0 : i32, i32
  }
  func.func @transform_2(%arg0: i32, %arg1: i32) -> (i32, i32) {
    %c0_i32 = arith.constant 0 : i32
    %c0_i32_0 = arith.constant 0 : i32
    %c0_i32_1 = arith.constant 0 : i32
    return %c0_i32, %c0_i32_0 : i32, i32
  }
  func.func @transform_3(%arg0: i32, %arg1: i32) -> (i32, i32, i32) {
    %c0_i32 = arith.constant 0 : i32
    %c0_i32_0 = arith.constant 0 : i32
    return %arg0, %c0_i32, %arg1 : i32, i32, i32
  }
}

</mosaic_0001>

<bundles_post_ra>
// kernel: pointwise_conv_relu_nchw.1
= control target key start
LH: loop header
LB: loop body
LE: loop exit
PB: predicated region body
PF: predicated region fallthrough
CT: control target
= control target key end

     0   :  { %s481_s12 = smov 0   ;;  %s483_s13 = smov 0   ;;  %s520_s0 = inlined_call_operand.vmem [shape: f32[2,4,256], index: 0, kind: input, shape index: {}]   ;;  %s521_s1 = inlined_call_operand.vmem [shape: f32[8,4], index: 1, kind: input, shape index: {}]   ;;  %s522_s2 = inlined_call_operand.vmem [shape: f32[8,1], index: 2, kind: input, shape index: {}]   ;;  %s523_s3 = inlined_call_operand.vmem [shape: f32[2,8,256], index: 3, kind: output, shape index: {}]  }
   0x1   :  { %s485_s14 = smov 0  }
   0x2 LB: > { %s25_s15 = sadd.s32 1, %s453_s13  ;;  %p395_p0 = scmp.ge.s32.totalorder %s457_s14, 1  ;;  %s457_s14 = sphi %s485_s14, %s13_s14   ;;  %s453_s13 = sphi %s483_s13, %s525_s13   ;;  %s449_s12 = sphi %s481_s12, %s524_s12  }
   0x3   : > { %p27_p1 = scmp.ge.s32.totalorder %s25_s15, 2  ;;  %p158_p2 = scmp.lt.s32.totalorder %s457_s14, 3 }
   0x5   : > { %s527_s15 = smov (%p27_p1, %s25_s15), 0  ;;  %p159_p3 = pnand %p395_p0, %p158_p2 }
   0x6   : > { %p191_p4 = scmp.lt.s32.totalorder (!%p159_p3), %s449_s12, 1 }
   0x7   : > { %162 = sbr.rel (%p159_p3) target bundleno = 220 (0xdc), region = 32 }
   0xc   : > { %v459_v0 = vmov 0.0   ;;  %v460_v1 = vmov 0   ;;  %v211_v2 = vld [vmem:[%s522_s2] sm:$0xff]  ;;  %s529_s12 = smov (!%p191_p4, %s449_s12), 1  ;;  %vm224_vm0 = vcmask 1043456   ;;  %vm220_vm1 = vcmask 31744  }
   0xd   : > { %293 = vmatprep.mubr.f32.mxu0 %v459_v0  ;;  %433 = vset.pattern.permute.xlu0 %v460_v1  ;;  %s405_s18 = sshll.u32 %s529_s12, 3  ;;  %v210_v5 = vld [vmem:[%s521_s1] sm:$0xff]  ;;  %s406_s24 = sshll.u32 %s529_s12, 4 }
   0xe   : > { %215 = vperm.xlu0 %433, %v211_v2   ;;  %s198_s21 = scalar_lea.vmem %s520_s0, %s405_s18  ;;  %s208_s27 = scalar_lea.vmem %s523_s3, %s406_s24 }
   0xf   : > { %v212_v3 = vld [vmem:[%s198_s21] sm:$0xff] }
  0x10   : > { %v219_v4 = vcombine.high %v212_v3, %v212_v3 }
  0x12   : > { %400 = vmatprep.subr.msk.mxu0 %vm224_vm0, %v219_v4 }
  0x13   : > { %401 = vmatpush1.msk.msra.mxu0 %vm224_vm0, %v212_v3 }
  0x14   : > { %402 = vmatmul.mubr.msk.f32.vlgmr.msra.gmra.mxu0 %vm220_vm1, %v210_v5 }
  0x89   : > { %v216_v6 = vpop.permute.xlu0 %215 }
  0xd4   : > { %v295_v7 = vpop.f32.mrf.mxu0 }
  0xd5   : > { %v296_v8 = vadd.f32 %v295_v7, %v216_v6 }
  0xd6   : > { %v297_v9 = vpop.f32.mrf.mxu0 }
  0xd7   : > { %v300_v10 = vmax.f32 %v296_v8, 0.0  ;;  %v298_v11 = vadd.f32 %v297_v9, %v216_v6 }
  0xd9   : > { %302 = vst [vmem:[%s208_s27] sm:$0xff] %v300_v10  ;;  %v301_v12 = vmax.f32 %v298_v11, 0.0 }
  0xdb   : > { %303 = vst [vmem:[%s208_s27 + $0x8] sm:$0xff] %v301_v12 }
  0xdc PF: > { %s13_s14 = sadd.s32 1, %s457_s14   ;;  %s524_s12 = smov %s453_s13 }
  0xdd   : > { %p10_p5 = scmp.ge.s32.totalorder %s13_s14, 4   ;;  %s525_s13 = smov %s527_s15 }
  0xdf   :  { %12 = sbr.rel (!%p10_p5) target bundleno = 2 (0x2), region = 62 }

</bundles_post_ra>
